<compile_context>
chip_gen: v6e
topology: v6e:2x2x1
jax: 0.10.0
libtpu: 0.0.40
codegen_flags: <defaults>
</compile_context>

<pallas_src>
import functools

import jax
import jax.numpy as jnp
from jax import lax
from jax.experimental import pallas as pl
from jax.experimental.pallas import tpu as pltpu


_LANE = 128


def _round_up(x, m):
    return (x + m - 1) // m * m


def _vmem_capacity_bytes():
    """Per-TensorCore VMEM capacity; conservative fallback if unavailable."""
    try:
        cap = getattr(pltpu.get_tpu_info(), "vmem_capacity_bytes", None)
        if cap:
            return int(cap)
    except Exception:
        pass
    return 64 << 20      # v7x per-core VMEM -- safe lower bound


def _largest_tile(n, target):
    """Largest multiple-of-128 divisor of n that is <= target (or None)."""
    t = (min(target, n) // _LANE) * _LANE
    while t >= _LANE:
        if n % t == 0:
            return t
        t -= _LANE
    return None


def _plan_tiles(batch, n, tile_target, vmem_cap):
    """Pick (N_pad, TM, TK) for the node dimension."""
    tile_target = max(int(tile_target), _LANE)
    if n <= tile_target:
        return n, n, n                       # one full block per batch element
    tk = _largest_tile(n, tile_target)
    if tk is None:
        # No clean 128-multiple divisor: zero-pad the node dim instead of
        # falling back to a full-N (VMEM-blowing) block.
        n_pad = _round_up(n, _LANE)
        tk = _largest_tile(n_pad, tile_target)
    else:
        n_pad = n
    tm = tk
    # v7x has 2 TensorCores sharing the grid's parallel axes: when B*n_m is
    # tiny, shrink TM (not TK) so both cores get m-tiles.
    if vmem_cap <= (64 << 20):
        while batch * (n_pad // tm) < 4 and tm >= 4 * _LANE and tm % (2 * _LANE) == 0:
            tm //= 2
    return n_pad, tm, tk


# --------------------------------------------------------------------------
# Kernels
# --------------------------------------------------------------------------

def _proj_kernel(x_ref, w_all_ref, loop_ref, fb_ref, *, f_out_pad):
    # x_ref:     (TP, F_in)
    # w_all_ref: (F_in, 3*F_out_pad)  = [W | ew*Wf | ew*Wb]  (zero-padded cols)
    # loop_ref:  (TP, F_out_pad)      x @ W
    # fb_ref:    (TP, 2*F_out_pad)    x @ [ew*Wf | ew*Wb]
    full = jnp.dot(x_ref[...], w_all_ref[...],
                   preferred_element_type=jnp.float32)
    loop_ref[...] = full[:, :f_out_pad].astype(loop_ref.dtype)
    fb_ref[...] = full[:, f_out_pad:].astype(fb_ref.dtype)


def _self_only_kernel(x_ref, w_ref, o_ref):
    # edge_weight == 0 path: plain projection.
    o_ref[...] = jnp.dot(x_ref[...], w_ref[...],
                         preferred_element_type=jnp.float32).astype(o_ref.dtype)


def _agg_kernel(loop_ref, fb_ref, adj_f_ref, adj_b_ref, o_ref, *acc_scratch,
                f_out_pad):
    # loop_ref:  (TM, F_out_pad)    x@W for this output tile   [resident over k]
    # fb_ref:    (TK, 2*F_out_pad)  [ew*x@Wf | ew*x@Wb] for this k tile
    # adj_f_ref: (TM, TK)           adj[m-rows, k-cols]
    # adj_b_ref: (TK, TM)           adj[k-rows, m-cols]  (consumed transposed)
    # o_ref:     (TM, F_out_pad)    lane-dense output tile     [resident over k]
    # acc_scratch: () for f32 outputs (accumulate straight into o_ref),
    #              (f32 VMEM scratch,) otherwise.
    k = pl.program_id(2)
    acc_ref = acc_scratch[0] if acc_scratch else o_ref

    @pl.when(k == 0)
    def _init():
        acc_ref[...] = loop_ref[...].astype(acc_ref.dtype)

    sup_f = fb_ref[:, :f_out_pad]          # 128-aligned, layout-friendly slices
    sup_b = fb_ref[:, f_out_pad:]

    # Forward edges: adj[m, k] @ sup_f.
    out_f = jnp.dot(adj_f_ref[...], sup_f, preferred_element_type=jnp.float32)
    # Backward edges: adj[k, m]^T @ sup_b, expressed as a dot_general that
    # contracts dim 0 of both operands -- no materialized transpose in VMEM.
    # (If a bundle dump ever shows Mosaic inserting a per-step vxpose of the
    # adj tile, switch this operand to a host-side pre-transposed adjacency.)
    out_b = lax.dot_general(adj_b_ref[...], sup_b,
                            dimension_numbers=(((0,), (0,)), ((), ())),
                            preferred_element_type=jnp.float32)

    acc_ref[...] += (out_f + out_b).astype(acc_ref.dtype)

    if acc_scratch:
        @pl.when(k == pl.num_programs(2) - 1)
        def _store():
            o_ref[...] = acc_ref[...].astype(o_ref.dtype)


# --------------------------------------------------------------------------
# Wrapper
# --------------------------------------------------------------------------

def selfgnn_forward(x, adj, w, w_fwd=None, w_bwd=None, *,
                    edge_weight=0.5, tile_target=None, stream_dtype=None):
    """x: (B, N, F_in), adj: (B, N, N), weights: (F_in, F_out)."""
    # edge_weight must be a static Python number (it selects code at trace
    # time, exactly like the torch module's __init__-time branch).
    if not isinstance(edge_weight, (int, float)):
        raise TypeError("edge_weight must be a static Python number")

    B, N, F_in = x.shape
    F_out = w.shape[1]
    F_out_pad = _round_up(F_out, _LANE)      # lane-dense output stores
    out_dtype = x.dtype

    vmem_cap = _vmem_capacity_bytes()
    if tile_target is None:
        # 1024-tiles on 128 MiB parts (v5e/v6e), 512 on 64 MiB parts (v7x).
        tile_target = 1024 if vmem_cap >= (96 << 20) else 512

    N_pad, TM, TK = _plan_tiles(B, N, tile_target, vmem_cap)
    n_m = N_pad // TM
    n_k = N_pad // TK

    def _pad_cols(m):
        if m.shape[1] == F_out_pad:
            return m
        return jnp.pad(m, ((0, 0), (0, F_out_pad - F_out)))

    w = w.astype(x.dtype)
    w_pad = _pad_cols(w)
    x_p = x if N_pad == N else jnp.pad(x, ((0, 0), (0, N_pad - N), (0, 0)))

    x_isz = x.dtype.itemsize
    out_isz = jnp.dtype(out_dtype).itemsize

    # ---------------- edge_weight == 0: self-loop projection only -----------
    if edge_weight == 0:
        out_pad = pl.pallas_call(
            _self_only_kernel,
            out_shape=jax.ShapeDtypeStruct((B, N_pad, F_out_pad), out_dtype),
            grid_spec=pltpu.PrefetchScalarGridSpec(
                num_scalar_prefetch=0,
                grid=(B, n_m),
                in_specs=[
                    pl.BlockSpec((pl.Squeezed(), TM, F_in),
                                 lambda b, m: (b, m, 0)),
                    pl.BlockSpec((F_in, F_out_pad), lambda b, m: (0, 0)),
                ],
                out_specs=pl.BlockSpec((pl.Squeezed(), TM, F_out_pad),
                                       lambda b, m: (b, m, 0)),
            ),
            compiler_params=pltpu.CompilerParams(
                dimension_semantics=("parallel", "parallel")),
        )(x_p, w_pad)
        return out_pad[:, :N, :F_out]

    if w_fwd is None or w_bwd is None:
        raise ValueError("edge_weight != 0 requires w_fwd and w_bwd")

    ew = float(edge_weight)
    fb_dtype = jnp.dtype(stream_dtype) if stream_dtype is not None else x.dtype
    fb_isz = fb_dtype.itemsize
    adj_in = adj if adj.dtype == fb_dtype else adj.astype(fb_dtype)
    adj_p = adj_in if N_pad == N else jnp.pad(
        adj_in, ((0, 0), (0, N_pad - N), (0, N_pad - N)))

    # Fold edge_weight into Wf/Wb host-side and fuse all three projections
    # into one wide (F_in, 3*F_out_pad) matrix for a single MXU matmul.
    w_all = jnp.concatenate(
        [w_pad,
         _pad_cols(ew * w_fwd.astype(x.dtype)),
         _pad_cols(ew * w_bwd.astype(x.dtype))], axis=1)

    # ---------------- stage 1: per-node projections (computed once) ---------
    proj_kernel = functools.partial(_proj_kernel, f_out_pad=F_out_pad)
    proj_vmem = (2 * TK * F_in * x_isz
                 + 2 * F_in * 3 * F_out_pad * x_isz
                 + 2 * TK * F_out_pad * out_isz
                 + 2 * TK * 2 * F_out_pad * fb_isz)
    proj_limit = int(min(max(proj_vmem + (16 << 20), 32 << 20),
                         int(0.9 * vmem_cap)))
    sup_loop, sup_fb = pl.pallas_call(
        proj_kernel,
        out_shape=(jax.ShapeDtypeStruct((B, N_pad, F_out_pad), out_dtype),
                   jax.ShapeDtypeStruct((B, N_pad, 2 * F_out_pad), fb_dtype)),
        grid_spec=pltpu.PrefetchScalarGridSpec(
            num_scalar_prefetch=0,
            grid=(B, n_k),
            in_specs=[
                pl.BlockSpec((pl.Squeezed(), TK, F_in),
                             lambda b, p: (b, p, 0)),
                pl.BlockSpec((F_in, 3 * F_out_pad), lambda b, p: (0, 0)),
            ],
            out_specs=(
                pl.BlockSpec((pl.Squeezed(), TK, F_out_pad),
                             lambda b, p: (b, p, 0)),
                pl.BlockSpec((pl.Squeezed(), TK, 2 * F_out_pad),
                             lambda b, p: (b, p, 0)),
            ),
        ),
        compiler_params=pltpu.CompilerParams(
            dimension_semantics=("parallel", "parallel"),
            vmem_limit_bytes=proj_limit),
    )(x_p, w_all)

    # ---------------- stage 2: adjacency aggregation -------------------------
    use_scratch = jnp.dtype(out_dtype) != jnp.float32
    agg_kernel = functools.partial(_agg_kernel, f_out_pad=F_out_pad)
    scratch_shapes = ([pltpu.VMEM((TM, F_out_pad), jnp.float32)]
                      if use_scratch else [])

    vmem_needed = (
        2 * TM * F_out_pad * out_isz             # sup_loop tile (dbl-buffered)
        + 2 * TK * 2 * F_out_pad * fb_isz        # sup_fb tile
        + 2 * 2 * TM * TK * fb_isz               # adj_f + adj_b tiles
        + 2 * TM * F_out_pad * out_isz           # output tile
        + (TM * F_out_pad * 4 if use_scratch else 0))
    vmem_limit = int(min(max(vmem_needed + (16 << 20), 32 << 20),
                         int(0.9 * vmem_cap)))

    cost = pl.CostEstimate(
        flops=2 * B * N_pad * N_pad * 2 * F_out_pad,
        transcendentals=0,
        bytes_accessed=(2 * B * N_pad * N_pad * fb_isz          # adj (fwd + bwd)
                        + n_m * B * N_pad * 2 * F_out_pad * fb_isz  # sup_fb re-reads
                        + 2 * B * N_pad * F_out_pad * out_isz),     # sup_loop + out
    )

    out_pad = pl.pallas_call(
        agg_kernel,
        out_shape=jax.ShapeDtypeStruct((B, N_pad, F_out_pad), out_dtype),
        grid_spec=pltpu.PrefetchScalarGridSpec(
            num_scalar_prefetch=0,
            grid=(B, n_m, n_k),                  # reduction axis (k) last
            in_specs=[
                # x@W rows for this output tile (constant over k -> resident)
                pl.BlockSpec((pl.Squeezed(), TM, F_out_pad),
                             lambda b, m, k: (b, m, 0)),
                # [ew*x@Wf | ew*x@Wb] rows for this reduction tile
                pl.BlockSpec((pl.Squeezed(), TK, 2 * F_out_pad),
                             lambda b, m, k: (b, k, 0)),
                # adj[m-rows, k-cols] for the forward term
                pl.BlockSpec((pl.Squeezed(), TM, TK),
                             lambda b, m, k: (b, m, k)),
                # adj[k-rows, m-cols] for the backward (transposed) term
                pl.BlockSpec((pl.Squeezed(), TK, TM),
                             lambda b, m, k: (b, k, m)),
            ],
            out_specs=pl.BlockSpec((pl.Squeezed(), TM, F_out_pad),
                                   lambda b, m, k: (b, m, 0)),
            scratch_shapes=scratch_shapes,
        ),
        compiler_params=pltpu.CompilerParams(
            dimension_semantics=("parallel", "parallel", "arbitrary"),
            vmem_limit_bytes=vmem_limit,
        ),
        cost_estimate=cost,
    )(sup_loop, sup_fb, adj_p, adj_p)

    return out_pad[:, :N, :F_out]


# --------------------------------------------------------------------------
# Reference & self-test
# --------------------------------------------------------------------------

def xavier_uniform(key, fan_in, fan_out, dtype=jnp.float32):
    # matches torch.nn.init.xavier_uniform_ semantics (gain=1)
    bound = (6.0 / (fan_in + fan_out)) ** 0.5
    return jax.random.uniform(key, (fan_in, fan_out), dtype, -bound, bound)


def _reference(x, adj, w, w_fwd, w_bwd, edge_weight):
    x = x.astype(jnp.float32)
    adj = adj.astype(jnp.float32)
    w, w_fwd, w_bwd = (a.astype(jnp.float32) for a in (w, w_fwd, w_bwd))
    sup_loop = jnp.einsum("bnf,fo->bno", x, w)
    sup_f = jnp.einsum("bnf,fo->bno", x, w_fwd)
    sup_b = jnp.einsum("bnf,fo->bno", x, w_bwd)
    return (sup_loop
            + edge_weight * jnp.einsum("bnm,bmo->bno", adj, sup_f)
            + edge_weight * jnp.einsum("bmn,bmo->bno", adj, sup_b))


if __name__ == "__main__":
    edge_weight = 0.5
    key = jax.random.PRNGKey(0)

    # --- case 1: tiny module-like shapes (single tile per batch element) ---
    B, N, F_in, F_out = 2, 16, 32, 32
    kx, ka, kw, kwf, kwb = jax.random.split(key, 5)
    x = jax.random.normal(kx, (B, N, F_in), jnp.float32)
    adj = jax.random.normal(ka, (B, N, N), jnp.float32)
    w = xavier_uniform(kw, F_in, F_out)
    w_fwd = xavier_uniform(kwf, F_in, F_out)
    w_bwd = xavier_uniform(kwb, F_in, F_out)

    out = jax.block_until_ready(
        selfgnn_forward(x, adj, w, w_fwd, w_bwd, edge_weight=edge_weight))
    ref = _reference(x, adj, w, w_fwd, w_bwd, edge_weight)
    assert out.shape == ref.shape
    assert jnp.allclose(out, ref, atol=1e-4, rtol=1e-4), "mismatch (small case)"

    # --- case 2: tiled accumulator path (grid = (B, 2, 2)), f32 o_ref acc ---
    B2, N2, Fi2, Fo2 = 2, 256, 64, 64
    k2 = jax.random.split(jax.random.PRNGKey(1), 5)
    x2 = jax.random.normal(k2[0], (B2, N2, Fi2), jnp.float32)
    adj2 = jax.random.normal(k2[1], (B2, N2, N2), jnp.float32)
    w2 = xavier_uniform(k2[2], Fi2, Fo2)
    wf2 = xavier_uniform(k2[3], Fi2, Fo2)
    wb2 = xavier_uniform(k2[4], Fi2, Fo2)
    out2 = jax.block_until_ready(
        selfgnn_forward(x2, adj2, w2, wf2, wb2,
                        edge_weight=edge_weight, tile_target=128))
    ref2 = _reference(x2, adj2, w2, wf2, wb2, edge_weight)
    assert out2.shape == ref2.shape
    assert jnp.allclose(out2, ref2, atol=1e-2, rtol=1e-3), "mismatch (tiled case)"

    # --- case 3: node-count padding path (N=200 has no 128-multiple divisor) ---
    B3, N3, Fi3, Fo3 = 1, 200, 32, 48
    k3 = jax.random.split(jax.random.PRNGKey(2), 5)
    x3 = jax.random.normal(k3[0], (B3, N3, Fi3), jnp.float32)
    adj3 = jax.random.normal(k3[1], (B3, N3, N3), jnp.float32)
    w3 = xavier_uniform(k3[2], Fi3, Fo3)
    wf3 = xavier_uniform(k3[3], Fi3, Fo3)
    wb3 = xavier_uniform(k3[4], Fi3, Fo3)
    out3 = jax.block_until_ready(
        selfgnn_forward(x3, adj3, w3, wf3, wb3,
                        edge_weight=edge_weight, tile_target=128))
    ref3 = _reference(x3, adj3, w3, wf3, wb3, edge_weight)
    assert out3.shape == ref3.shape
    assert jnp.allclose(out3, ref3, atol=1e-2, rtol=1e-3), "mismatch (padded case)"

    # --- case 4: edge_weight == 0 branch (self-loop projection only) ---
    out4 = jax.block_until_ready(selfgnn_forward(x, adj, w, edge_weight=0.0))
    ref4 = jnp.einsum("bnf,fo->bno", x, w)
    assert out4.shape == ref4.shape
    assert jnp.allclose(out4, ref4, atol=1e-4, rtol=1e-4), "mismatch (ew=0 case)"

    # --- case 5: bf16 inputs exercise the f32-scratch accumulator path ---
    xb = x.astype(jnp.bfloat16)
    adjb = adj.astype(jnp.bfloat16)
    wb = w.astype(jnp.bfloat16)
    wfb = w_fwd.astype(jnp.bfloat16)
    wbb = w_bwd.astype(jnp.bfloat16)
    out5 = jax.block_until_ready(
        selfgnn_forward(xb, adjb, wb, wfb, wbb, edge_weight=edge_weight))
    ref5 = _reference(xb, adjb, wb, wfb, wbb, edge_weight)
    assert out5.shape == ref5.shape
    assert jnp.allclose(out5.astype(jnp.float32), ref5, atol=0.5, rtol=0.05), \
        "mismatch (bf16 case)"

    print("KERNEL_OK")
</pallas_src>

<mosaic_0001>
module attributes {stable_mosaic.version = 11 : i64} {
  func.func @_proj_kernel(%arg0: i32, %arg1: i32, %arg2: memref<1x16x32xf32, #tpu.memory_space<vmem>>, %arg3: memref<32x384xf32, #tpu.memory_space<vmem>>, %arg4: memref<1x16x128xf32, #tpu.memory_space<vmem>>, %arg5: memref<1x16x256xf32, #tpu.memory_space<vmem>>) attributes {dimension_semantics = [#tpu.dimension_semantics<parallel>, #tpu.dimension_semantics<parallel>], iteration_bounds = array<i64: 2, 1>, scalar_prefetch = 0 : i64, scratch_operands = 0 : i64, tpu.core_type = #tpu.core_type<tc>, window_params = [{transform_indices = @transform_0, window_bounds = array<i64: 1, 16, 32>}, {pipeline_mode = #tpu.pipeline_mode<synchronous>, transform_indices = @transform_1, window_bounds = array<i64: 32, 384>}, {transform_indices = @transform_2, window_bounds = array<i64: 1, 16, 128>}, {transform_indices = @transform_3, window_bounds = array<i64: 1, 16, 256>}]} {
    %c0 = arith.constant 0 : index
    %c0_0 = arith.constant 0 : index
    %c0_1 = arith.constant 0 : index
    %0 = vector.load %arg2[%c0, %c0_0, %c0_1] : memref<1x16x32xf32, #tpu.memory_space<vmem>>, vector<1x16x32xf32>
    %1 = vector.shape_cast %0 : vector<1x16x32xf32> to vector<16x32xf32>
    %c0_2 = arith.constant 0 : index
    %c0_3 = arith.constant 0 : index
    %2 = vector.load %arg3[%c0_2, %c0_3] : memref<32x384xf32, #tpu.memory_space<vmem>>, vector<32x384xf32>
    %cst = arith.constant dense<0.000000e+00> : vector<16x384xf32>
    %3 = tpu.matmul %1, %2, %cst {dimension_numbers = #tpu.dot_dimension_numbers<[1], [0], [0], [1], [0, 0, 1, 1], [], []>} : vector<16x32xf32>, vector<32x384xf32>, vector<16x384xf32> -> vector<16x384xf32>
    %4 = vector.extract_strided_slice %3 {offsets = [0, 0], sizes = [16, 128], strides = [1, 1]} : vector<16x384xf32> to vector<16x128xf32>
    %c0_4 = arith.constant 0 : index
    %c0_5 = arith.constant 0 : index
    %c0_6 = arith.constant 0 : index
    %5 = vector.load %arg4[%c0_4, %c0_5, %c0_6] : memref<1x16x128xf32, #tpu.memory_space<vmem>>, vector<1x16x128xf32>
    %6 = vector.shape_cast %5 : vector<1x16x128xf32> to vector<16x128xf32>
    %7 = vector.shape_cast %4 : vector<16x128xf32> to vector<1x16x128xf32>
    tpu.vector_store %arg4[%c0_4, %c0_5, %c0_6], %7 {strides = array<i32>} : memref<1x16x128xf32, #tpu.memory_space<vmem>>, vector<1x16x128xf32>,
    %8 = vector.extract_strided_slice %3 {offsets = [0, 128], sizes = [16, 256], strides = [1, 1]} : vector<16x384xf32> to vector<16x256xf32>
    %c0_7 = arith.constant 0 : index
    %c0_8 = arith.constant 0 : index
    %c0_9 = arith.constant 0 : index
    %9 = vector.load %arg5[%c0_7, %c0_8, %c0_9] : memref<1x16x256xf32, #tpu.memory_space<vmem>>, vector<1x16x256xf32>
    %10 = vector.shape_cast %9 : vector<1x16x256xf32> to vector<16x256xf32>
    %11 = vector.shape_cast %8 : vector<16x256xf32> to vector<1x16x256xf32>
    tpu.vector_store %arg5[%c0_7, %c0_8, %c0_9], %11 {strides = array<i32>} : memref<1x16x256xf32, #tpu.memory_space<vmem>>, vector<1x16x256xf32>,
    return
  }
  func.func @transform_0(%arg0: i32, %arg1: i32) -> (i32, i32, i32) {
    %c0_i32 = arith.constant 0 : i32
    %c0_i32_0 = arith.constant 0 : i32
    return %arg0, %arg1, %c0_i32 : i32, i32, i32
  }
  func.func @transform_1(%arg0: i32, %arg1: i32) -> (i32, i32) {
    %c0_i32 = arith.constant 0 : i32
    %c0_i32_0 = arith.constant 0 : i32
    %c0_i32_1 = arith.constant 0 : i32
    return %c0_i32, %c0_i32_0 : i32, i32
  }
  func.func @transform_2(%arg0: i32, %arg1: i32) -> (i32, i32, i32) {
    %c0_i32 = arith.constant 0 : i32
    %c0_i32_0 = arith.constant 0 : i32
    return %arg0, %arg1, %c0_i32 : i32, i32, i32
  }
  func.func @transform_3(%arg0: i32, %arg1: i32) -> (i32, i32, i32) {
    %c0_i32 = arith.constant 0 : i32
    %c0_i32_0 = arith.constant 0 : i32
    return %arg0, %arg1, %c0_i32 : i32, i32, i32
  }
}

</mosaic_0001>

<bundles_post_ra>
// kernel: tpu_custom_call.1
= control target key start
LH: loop header
LB: loop body
LE: loop exit
PB: predicated region body
PF: predicated region fallthrough
CT: control target
= control target key end

     0   :  { %9 = vsyncpa [#allocation3], 0  ;;  %s1152_s0 = inlined_call_operand.hbm [shape: f32[2,16,32], index: 0, kind: input, shape index: {}]   ;;  %s1153_s1 = inlined_call_operand.hbm [shape: f32[32,384], index: 1, kind: input, shape index: {}]   ;;  %s1154_s2 = inlined_call_operand.hbm [shape: f32[2,16,128], index: 2, kind: output, shape index: {0}]   ;;  %s1155_s3 = inlined_call_operand.hbm [shape: f32[2,16,256], index: 3, kind: output, shape index: {1}]  }
   0x1   :  { %11 = vsyncpa [#allocation3 + $0x1], 0 }
   0x2   :  { %12 = vsyncpa [#allocation6], 0 }
   0x3   :  { %13 = vsyncpa [#allocation4], 0 }
   0x4   :  { %15 = vsyncpa [#allocation4 + $0x1], 0 }
   0x5   :  { %16 = vsyncpa [#allocation9], 0 }
   0x6   :  { %18 = vsyncpa [#allocation9 + $0x1], 0  ;;  %s924_s12 = smov 0   ;;  %s926_s13 = smov 0  }
   0x7   :  { %s928_s14 = smov 0   ;;  %s930_s15 = smov 0  }
   0x8   :  { %s932_s16 = smov 0   ;;  %s934_s17 = smov 0  }
   0x9 LB: > { %s589_s18 = sadd.s32 4294967295, %s889_s17   ;;  %s590_s19 = sadd.s32 4294967294, %s889_s17   ;;  %s889_s17 = sphi %s934_s17, %s24_s17   ;;  %s885_s16 = sphi %s932_s16, %s1173_s16   ;;  %s881_s15 = sphi %s930_s15, %s1172_s15   ;;  %s877_s14 = sphi %s928_s14, %s1171_s14   ;;  %s873_s13 = sphi %s926_s13, %s1170_s13   ;;  %s869_s12 = sphi %s924_s12, %s1169_s12  }
   0xa   : > { %p58_p0 = scmp.ne.s32.totalorder %s873_s13, %s869_s12  ;;  %p958_p1 = scmp.eq.s32.totalorder %s589_s18, 0 }
   0xb   : > { %p962_p2 = scmp.eq.s32.totalorder %s589_s18, 1  ;;  %p111_p3 = scmp.eq.s32.totalorder %s590_s19, 1 }
   0xc   : > { %p968_p4 = por %p958_p1, %p58_p0  ;;  %p591_p5 = scmp.ge.s32.totalorder %s889_s17, 1 }
   0xd   : > { %p973_p6 = por %p111_p3, %p58_p0  ;;  %p146_p7 = scmp.lt.s32.totalorder %s889_s17, 3 }
   0xe   : > { %s1159_s22 = scalar_select %p968_p4, 1, 0 }
   0xf   : > { %s1160_s23 = scalar_select %p973_p6, 1, 0 }
  0x10   : > { %p978_p8 = pnand %p591_p5, %p146_p7  ;;  %s891_s25 = smov [#allocation5]  }
  0x11   : > { %s158_s26 = sshll.u32 %s891_s25, 4  ;;  %s36_s28 = sadd.s32 1, %s885_s16  ;;  %s159_s26 = int_to_ptr.vmem [resolvable:$true] %s158_s26 }
  0x12   : > { %p644_p9 = pneg %p978_p8  ;;  %s732_s29 = scalar_lea.vmem %s159_s26, 1536 }
  0x13   : > { %p733_p13 = scmp.ne.s32.totalorder %s159_s26, %s732_s29  ;;  %p740_p5 = scmp.lt.s32.totalorder %s159_s26, %s159_s26 }
  0x14   : > { %p987_p11 = pnand %p644_p9, %p958_p1  ;;  %p741_p7 = scmp.lt.s32.totalorder %s732_s29, %s732_s29 }
  0x16   : > { %p723_p12 = pneg %p987_p11  ;;  %p742_p6 = por %p741_p7, %p740_p5 }
  0x18   : > { %p735_p0 = pnand %p733_p13, %p723_p12 }
  0x1a   : > { %p736_p3 = pneg %p735_p0 }
  0x1c   : > { %p743_p4 = pnand %p742_p6, %p736_p3 }
  0x1e   : > { %746 = shalt.err (!%p743_p4)
}
  0x1f   : > { %s892_s30 = smov 384   ;;  %s893_s4 = smov 24  }
  0x20   : > { %647 = dma.hbm_to_vmem [thread:$0]  (!%p987_p11), %s1153_s1, 1536, %s159_s26, [#allocation6], %s892_s30, %s892_s30, %s893_s4  }
  0x21   : > { %p38_p6 = scmp.ge.s32.totalorder %s36_s28, 2  ;;  %s45_s7 = sadd.s32 1, %s877_s14 }
  0x22   : > { %p52_p4 = scmp.ne.s32.totalorder %s877_s14, %s873_s13  ;;  %p53_p9 = scmp.eq.s32.totalorder %s889_s17, 0 }
  0x23   : > { %s1175_s28 = smov (%p38_p6, %s36_s28), 0  ;;  %p660_p0 = scmp.lt.s32.totalorder %s889_s17, 2 }
  0x24   : > { %p1005_p12 = por %p53_p9, %p52_p4  ;;  %p1011_p13 = por %p962_p2, %p52_p4 }
  0x25   : > { %s40_s10 = ssub.s32 %s885_s16, %s1175_s28  ;;  %s172_s11 = sand.u32 1, %s877_s14  }
  0x26   : > { %p43_p11 = scmp.eq.s32.totalorder %s40_s10, 0  ;;  %s594_s18 = sshll.u32 %s172_s11, 4 }
  0x27   : > { %s614_s25 = sshll.u32 %s885_s16, 8  ;;  %s176_s30 = scalar_lea.vmem [#allocation2], %s594_s18 }
  0x28   : > { %s1020_s19 = scalar_select %p43_p11, %s877_s14, %s45_s7  }
  0x29   : > { %s184_s29 = scalar_lea.hbm %s1152_s0, %s614_s25  ;;  %s185_s4 = sshll.u32 %s176_s30, 4  ;;  %s186_s4 = int_to_ptr.vmem [resolvable:$true] %s185_s4 }
  0x2a   : > { %p1028_p2 = pnand %p660_p0, %p1005_p12  ;;  %s173_s5 = scalar_lea.sflag [#allocation3], %s172_s11 }
  0x2b   : > { %s760_s6 = scalar_lea.vmem %s186_s4, 256  ;;  %s894_s7 = smov [#allocation2]  }
  0x2c   : > { %p749_p3 = pneg %p1028_p2  ;;  %p761_p5 = scmp.ne.s32.totalorder %s186_s4, %s760_s6 }
  0x2d   : > { %s765_s10 = sshll.u32 %s894_s7, 4  ;;  %s766_s10 = int_to_ptr.vmem [resolvable:$false] %s765_s10 }
  0x2e   : > { %p763_p7 = pnand %p761_p5, %p749_p3  ;;  %s767_s25 = scalar_lea.vmem %s766_s10, 512 }
  0x2f   : > { %p768_p4 = scmp.lt.s32.totalorder %s186_s4, %s766_s10  ;;  %p769_p9 = scmp.lt.s32.totalorder %s767_s25, %s760_s6 }
  0x30   : > { %p764_p6 = pneg %p763_p7 }
  0x31   : > { %p770_p11 = por %p769_p9, %p768_p4 }
  0x33   : > { %p771_p10 = pnand %p770_p11, %p764_p6 }
  0x35   : > { %774 = shalt.err (!%p771_p10)
}
  0x36   : > { %s895_s8 = smov 128   ;;  %s896_s18 = smov 8  }
  0x37   : > { %651 = dma.hbm_to_vmem [thread:$0]  (!%p1028_p2), %s184_s29, 256, %s186_s4, %s173_s5, %s895_s8, %s895_s8, %s896_s18  }
  0x38   : > { %197 = sbr.rel (%p978_p8) target bundleno = 308 (0x134), region = 28  ;;  %s1039_s11 = sand.u32 (!%p978_p8), 1, %s873_s13  }
  0x39   : > { %s598_s26 = sshll.u32 (!%p978_p8), %s1039_s11, 4  ;;  %s200_s27 = scalar_lea.sflag (!%p978_p8), [#allocation3], %s1039_s11 }
  0x3a   : > { %s1045_s30 = scalar_lea.vmem (!%p978_p8), [#allocation2], %s598_s26  ;;  %p1166_p10 = scmp.ne.s32.totalorder (!%p978_p8), %s1159_s22, 0 }
  0x3d   : > { %852 = dma.done.wait (%p1166_p10), %s200_s27, 256  }
  0x3e   : > { %854 = vsyncadd (%p1166_p10), %s200_s27, 4294967040 }
  0x3f   : > { %856 = dma.done.wait (%p958_p1), [#allocation6], 1536  }
  0x40   : > { %858 = vsyncadd (%p958_p1), [#allocation6], 4294965760  ;;  %v897_v0 = vmov 0.0   ;;  %v250_v1 = vld [vmem:[#allocation5 + $0x50] sm:$0xff]  ;;  %v249_v2 = vld [vmem:[#allocation5 + $0x48] sm:$0xff]  ;;  %vm252_vm0 = vcmask 261120  }
  0x41   : > { %323 = vmatprep.mubr.f32.mxu0 %v897_v0  ;;  %v247_v3 = vld [vmem:[#allocation5 + $0x38] sm:$0xff]  ;;  %283 = vmatprep.subr.mxu0 %v250_v1  ;;  %v246_v5 = vld [vmem:[#allocation5 + $0x30] sm:$0xff]  ;;  %v244_v6 = vld [vmem:[#allocation5 + $0x20] sm:$0xff]  ;;  %s601_s20 = sshll.u32 %s1039_s11, 5  ;;  %s227_s22 = scalar_lea.vmem [#allocation7], %s598_s26 }
  0x42   : > { %v251_v4 = vld [vmem:[#allocation5 + $0x58] sm:$0xff]  ;;  %284 = vmatpush1.msra.mxu0 %v249_v2  ;;  %v248_v7 = vld [vmem:[#allocation5 + $0x40] sm:$0xff]  ;;  %v245_v9 = vld [vmem:[#allocation5 + $0x28] sm:$0xff]  ;;  %s438_s24 = sshll.u32 %s227_s22, 4  ;;  %s1060_s29 = scalar_lea.vmem [#allocation8], %s601_s20  ;;  %s1064_s24 = int_to_ptr.vmem [resolvable:$true] %s438_s24 }
  0x43   : > { %623 = vmatprep.subr.mxu1 %v251_v4  ;;  %285 = vmatprep.subr.mxu0 %v247_v3  ;;  %v243_v8 = vld [vmem:[#allocation5 + $0x18] sm:$0xff]  ;;  %v241_v10 = vld [vmem:[#allocation5 + $0x8] sm:$0xff]  ;;  %v240_v11 = vld [vmem:[#allocation5] sm:$0xff]  ;;  %s457_s4 = sshll.u32 %s1060_s29, 4  ;;  %s615_s21 = sshll.u32 %s881_s15, 8  ;;  %s1066_s4 = int_to_ptr.vmem [resolvable:$true] %s457_s4 }
  0x44   : > { %624 = vmatpush3.msra.mxu1 %v251_v4  ;;  %286 = vmatpush1.msra.mxu0 %v246_v5  ;;  %v242_v12 = vld [vmem:[#allocation5 + $0x10] sm:$0xff]  ;;  %v239_v14 = vld [vmem:[%s1045_s30 + $0x8] sm:$0xff]  ;;  %s616_s5 = sshll.u32 %s881_s15, 9  ;;  %s1072_s10 = scalar_lea.hbm %s1154_s2, %s615_s21 }
  0x45   : > { %625 = vmatprep.subr.mxu1 %v248_v7  ;;  %287 = vmatprep.subr.mxu0 %v244_v6  ;;  %v238_v13 = vld [vmem:[%s1045_s30] sm:$0xff]  ;;  %s1079_s18 = scalar_lea.hbm %s1155_s3, %s616_s5  ;;  %s418_s15 = scalar_lea.sflag [#allocation4], %s1039_s11 }
  0x46   : > { %626 = vmatpush3.msra.mxu1 %v248_v7  ;;  %288 = vmatpush1.msra.mxu0 %v243_v8  ;;  %s775_s26 = scalar_lea.vmem %s1064_s24, 256  ;;  %s898_s27 = smov [#allocation7]  }
  0x47   : > { %627 = vmatprep.subr.mxu1 %v245_v9  ;;  %289 = vmatprep.subr.mxu0 %v241_v10  ;;  %p776_p1 = scmp.ne.s32.totalorder %s1064_s24, %s775_s26  ;;  %s779_s30 = sshll.u32 %s898_s27, 4  ;;  %s780_s30 = int_to_ptr.vmem [resolvable:$false] %s779_s30 }
  0x48   : > { %628 = vmatpush3.msra.mxu1 %v245_v9  ;;  %290 = vmatpush1.msra.mxu0 %v240_v11  ;;  %s781_s20 = scalar_lea.vmem %s780_s30, 512  ;;  %p782_p0 = scmp.lt.s32.totalorder %s1064_s24, %s780_s30 }
  0x49   : > { %629 = vmatprep.subr.mxu1 %v242_v12  ;;  %602 = vmatmul.mubr.msk.f32.vlgmr.msra.gmra.mxu0 %vm252_vm0, %v238_v13  ;;  %p777_p8 = pnand %p776_p1, %p1011_p13  ;;  %p783_p2 = scmp.lt.s32.totalorder %s781_s20, %s775_s26 }
  0x4a   : > { %630 = vmatpush3.msra.mxu1 %v242_v12  ;;  %631 = vmatprep.mubr.msk.f32.mxu1 %vm252_vm0, %v238_v13 }
  0x4b   : > { %329 = vmatprep.mubr.f32.mxu0 %v897_v0  ;;  %632 = vmatmul.mubr.msk.f32.vlgmr.msra.gmra.mxu1 %vm252_vm0, %v239_v14  ;;  %p778_p12 = pneg %p777_p8  ;;  %p784_p3 = por %p783_p2, %p782_p0 }
  0x4d   : > { %603 = vmatmul.mubr.msk.f32.gmra.mxu0 %vm252_vm0, %v239_v14  ;;  %p785_p5 = pnand %p784_p3, %p778_p12 }
 0x109   : > { %v325_v15 = vpop.f32.mrf.mxu0 }
 0x10a   : > { %411 = vst [vmem:[%s227_s22] sm:$0xff] %v325_v15 }
 0x10b   : > { %v327_v16 = vpop.f32.mrf.mxu0  ;;  %v633_v17 = vpop.f32.mrf.mxu1 }
 0x10c   : > { %413 = vst [vmem:[%s1060_s29] sm:$0xff] %v327_v16  ;;  %416 = vst [vmem:[%s1060_s29 + $0x18] sm:$0xff] %v633_v17 }
 0x10d   : > { %v331_v18 = vpop.f32.mrf.mxu0  ;;  %v402_v19 = vpop.f32.mrf.mxu1 }
 0x10e   : > { %412 = vst [vmem:[%s227_s22 + $0x8] sm:$0xff] %v331_v18  ;;  %414 = vst [vmem:[%s1060_s29 + $0x8] sm:$0xff] %v402_v19 }
 0x10f   : > { %v333_v20 = vpop.f32.mrf.mxu0 }
 0x110   : > { %788 = shalt.err (!%p785_p5)
}
 0x111   : > { %s789_s22 = scalar_lea.hbm %s1072_s10, 256  ;;  %s793_s6 = scalar_lea.hbm %s1154_s2, 512 }
 0x112   : > { %p790_p7 = scmp.ne.s32.totalorder %s1072_s10, %s789_s22  ;;  %p794_p9 = scmp.lt.s32.totalorder %s1072_s10, %s1154_s2 }
 0x113   : > { %p795_p11 = scmp.lt.s32.totalorder %s793_s6, %s789_s22 }
 0x114   : > { %p791_p6 = pnand %p790_p7, %p1011_p13 }
 0x115   : > { %p796_p10 = por %p795_p11, %p794_p9 }
 0x116   : > { %p792_p4 = pneg %p791_p6 }
 0x118   : > { %p797_p1 = pnand %p796_p10, %p792_p4 }
 0x11a   : > { %800 = shalt.err (!%p797_p1)
}
 0x11b   : > { %s899_s8 = smov 128   ;;  %s900_s26 = smov 8   ;;  %415 = vst [vmem:[%s1060_s29 + $0x10] sm:$0xff] %v333_v20 }
 0x11c   : > { %640 = dma.vmem_to_hbm [thread:$0]  (%p1011_p13), %s1064_s24, 256, %s1072_s10, %s418_s15, %s899_s8, %s899_s8, %s900_s26  }
 0x11d   : > { %s423_s27 = scalar_lea.sflag [#allocation9], %s1039_s11  ;;  %s801_s30 = scalar_lea.vmem %s1066_s4, 512 }
 0x11e   : > { %p802_p8 = scmp.ne.s32.totalorder %s1066_s4, %s801_s30  ;;  %s901_s20 = smov [#allocation8]  }
 0x11f   : > { %s805_s22 = sshll.u32 %s901_s20, 4  ;;  %s806_s22 = int_to_ptr.vmem [resolvable:$false] %s805_s22 }
 0x120   : > { %p803_p12 = pnand %p802_p8, %p1011_p13  ;;  %s807_s21 = scalar_lea.vmem %s806_s22, 1024 }
 0x121   : > { %p808_p2 = scmp.lt.s32.totalorder %s1066_s4, %s806_s22  ;;  %p809_p3 = scmp.lt.s32.totalorder %s807_s21, %s801_s30 }
 0x122   : > { %p804_p0 = pneg %p803_p12 }
 0x123   : > { %p810_p5 = por %p809_p3, %p808_p2 }
 0x125   : > { %p811_p7 = pnand %p810_p5, %p804_p0 }
 0x127   : > { %814 = shalt.err (!%p811_p7)
}
 0x128   : > { %s815_s24 = scalar_lea.hbm %s1079_s18, 512  ;;  %s819_s15 = scalar_lea.hbm %s1155_s3, 1024 }
 0x129   : > { %p816_p6 = scmp.ne.s32.totalorder %s1079_s18, %s815_s24  ;;  %p820_p11 = scmp.lt.s32.totalorder %s1079_s18, %s1155_s3 }
 0x12a   : > { %p821_p10 = scmp.lt.s32.totalorder %s819_s15, %s815_s24 }
 0x12b   : > { %p817_p4 = pnand %p816_p6, %p1011_p13 }
 0x12c   : > { %p822_p1 = por %p821_p10, %p820_p11 }
 0x12d   : > { %p818_p9 = pneg %p817_p4 }
 0x12f   : > { %p823_p8 = pnand %p822_p1, %p818_p9 }
 0x131   : > { %826 = shalt.err (!%p823_p8)
}
 0x132   : > { %s902_s7 = smov 256   ;;  %s903_s25 = smov 16  }
 0x133   : > { %641 = dma.vmem_to_hbm [thread:$0]  (%p1011_p13), %s1066_s4, 512, %s1079_s18, %s423_s27, %s902_s7, %s902_s7, %s903_s25  }
 0x134 PF: > { %s472_s8 = sand.u32 1, %s869_s12   ;;  %p1167_p12 = scmp.ne.s32.totalorder %s1160_s23, 0 }
 0x135   : > { %p1168_p0 = scmp.ge.s32.totalorder %s889_s17, 2  ;;  %s473_s26 = scalar_lea.sflag [#allocation4], %s472_s8 }
 0x137   : > { %p653_p2 = pnand %p1168_p0, %p1167_p12 }
 0x139   : > { %p654_p3 = pneg %p653_p2 }
 0x13b   : > { %860 = dma.done.wait (%p654_p3), %s473_s26, 256  }
 0x13c   : > { %862 = vsyncadd (%p654_p3), %s473_s26, 4294967040  ;;  %s482_s30 = scalar_lea.sflag [#allocation9], %s472_s8 }
 0x13d   : > { %864 = dma.done.wait (%p654_p3), %s482_s30, 512  }
 0x13e   : > { %866 = vsyncadd (%p654_p3), %s482_s30, 4294966784  ;;  %s24_s17 = sadd.s32 1, %s889_s17   ;;  %s1169_s12 = smov %s873_s13 }
 0x13f   : > { %p21_p5 = scmp.ge.s32.totalorder %s24_s17, 4   ;;  %s1170_s13 = smov %s877_s14 }
 0x140   : > { %s1171_s14 = smov %s1020_s19  ;;  %s1172_s15 = smov %s885_s16 }
 0x141   : > { %s1173_s16 = smov %s1175_s28  ;;  %23 = sbr.rel (!%p21_p5) target bundleno = 9 (0x9), region = 94 }
 0x146   :  { %487 = vsyncpa [#allocation3], 1 }
 0x147   :  { %489 = vsyncpa [#allocation3 + $0x1], 1 }
 0x148   :  { %490 = vsyncpa [#allocation6], 1 }
 0x149   :  { %491 = vsyncpa [#allocation4], 1 }
 0x14a   :  { %493 = vsyncpa [#allocation4 + $0x1], 1 }
 0x14b   :  { %494 = vsyncpa [#allocation9], 1 }
 0x14c   :  { %496 = vsyncpa [#allocation9 + $0x1], 1 }

</bundles_post_ra>
